<compile_context>
chip_gen: v5e
topology: v5e:2x2
jax: 0.10.0
libtpu: 0.0.40
codegen_flags: <defaults>
</compile_context>

<pallas_src>
import jax
import jax.numpy as jnp
from jax.experimental import pallas as pl
from jax.experimental.pallas import tpu as pltpu


def _identity_kernel(p_ref, o_ref):
    # forward(): return self.params  -> straight copy of the current tile.
    o_ref[...] = p_ref[...]


def _pick_tile_rows(R, C, dtype, block_budget_bytes=6 << 20):
    """Largest row-tile (multiple of the packed sublane count) within budget."""
    itemsize = jnp.dtype(dtype).itemsize
    packing = max(1, 4 // itemsize)          # 1 for f32, 2 for bf16, 4 for int8
    row_align = 8 * packing                  # sublane multiple for this dtype
    row_bytes = max(1, C * itemsize)
    tile_r = (block_budget_bytes // row_bytes) // row_align * row_align
    tile_r = max(row_align, tile_r)
    if tile_r >= R:
        return R                             # full array dim: single grid step
    return tile_r


def _copy_2d(x2d):
    R, C = x2d.shape
    tile_r = _pick_tile_rows(R, C, x2d.dtype)
    grid = (pl.cdiv(R, tile_r),)
    return pl.pallas_call(
        _identity_kernel,
        out_shape=jax.ShapeDtypeStruct((R, C), x2d.dtype),
        grid=grid,
        # Full last dim in every block: lane-dense stores + contiguous DMAs.
        in_specs=[pl.BlockSpec((tile_r, C), lambda i: (i, 0))],
        out_specs=pl.BlockSpec((tile_r, C), lambda i: (i, 0)),
        compiler_params=pltpu.CompilerParams(
            dimension_semantics=("parallel",),      # v7x: both TCs split the copy
            vmem_limit_bytes=32 * 1024 * 1024,      # safe on v5e/v6e/v7x
        ),
    )(x2d)


def parameter_model_forward(params):
    """Pallas equivalent of ParameterModel.forward(): returns params.

    NOTE: the zero-cost implementation is simply `return params`; the kernel
    exists to exercise the Pallas path and is tiled for max HBM bandwidth.
    """
    orig_shape = params.shape
    if params.ndim == 2:
        return _copy_2d(params)
    # Flatten to a lane-dense 2D slab (layout plumbing only), copy, reshape back.
    if params.ndim == 0:
        flat = params.reshape(1, 1)
    elif params.ndim == 1:
        flat = params.reshape(1, -1)
    else:
        flat = params.reshape(-1, orig_shape[-1])
    out = _copy_2d(flat)
    return out.reshape(orig_shape)


if __name__ == "__main__":
    # Deterministic parameter init (the "start" tensor passed to __init__).
    key = jax.random.PRNGKey(0)
    start = jax.random.normal(key, (16, 256), dtype=jnp.float32)

    out = parameter_model_forward(start)
    out = jax.block_until_ready(out)

    assert out.shape == start.shape and out.dtype == start.dtype
    assert bool(jnp.all(out == start))
    print("KERNEL_OK")
</pallas_src>

<mosaic_0001>
module attributes {stable_mosaic.version = 11 : i64} {
  func.func @_identity_kernel(%arg0: i32, %arg1: memref<16x256xf32, #tpu.memory_space<vmem>>, %arg2: memref<16x256xf32, #tpu.memory_space<vmem>>) attributes {dimension_semantics = [#tpu.dimension_semantics<parallel>], iteration_bounds = array<i64: 1>, scalar_prefetch = 0 : i64, scratch_operands = 0 : i64, tpu.core_type = #tpu.core_type<tc>, window_params = [{transform_indices = @transform_0, window_bounds = array<i64: 16, 256>}, {transform_indices = @transform_1, window_bounds = array<i64: 16, 256>}]} {
    %c0 = arith.constant 0 : index
    %c0_0 = arith.constant 0 : index
    %0 = vector.load %arg1[%c0, %c0_0] : memref<16x256xf32, #tpu.memory_space<vmem>>, vector<16x256xf32>
    %c0_1 = arith.constant 0 : index
    %c0_2 = arith.constant 0 : index
    %1 = vector.load %arg2[%c0_1, %c0_2] : memref<16x256xf32, #tpu.memory_space<vmem>>, vector<16x256xf32>
    tpu.vector_store %arg2[%c0_1, %c0_2], %0 {strides = array<i32>} : memref<16x256xf32, #tpu.memory_space<vmem>>, vector<16x256xf32>,
    return
  }
  func.func @transform_0(%arg0: i32) -> (i32, i32) {
    %c0_i32 = arith.constant 0 : i32
    %c0_i32_0 = arith.constant 0 : i32
    return %arg0, %c0_i32 : i32, i32
  }
  func.func @transform_1(%arg0: i32) -> (i32, i32) {
    %c0_i32 = arith.constant 0 : i32
    %c0_i32_0 = arith.constant 0 : i32
    return %arg0, %c0_i32 : i32, i32
  }
}

</mosaic_0001>

<bundles_post_ra>
// kernel: tpu_custom_call.1
= control target key start
LH: loop header
LB: loop body
LE: loop exit
PB: predicated region body
PF: predicated region fallthrough
CT: control target
= control target key end

     0   :  { %6 = vsyncpa [#allocation3], 0  ;;  %s128_s0 = inlined_call_operand.hbm [shape: f32[16,256], index: 0, kind: input, shape index: {}]   ;;  %s129_s1 = inlined_call_operand.hbm [shape: f32[16,256], index: 1, kind: output, shape index: {}]  }
   0x1   :  { %7 = vsyncpa [#allocation4], 0  ;;  %s12_s8 = sshll.u32 %s128_s0, 4  ;;  %s108_s9 = smov [#allocation2]   ;;  %s13_s8 = int_to_ptr.hbm [resolvable:$true] %s12_s8 }
   0x2   :  { %s14_s10 = sshll.u32 %s108_s9, 4  ;;  %s109_s11 = smov 256   ;;  %s15_s10 = int_to_ptr.vmem [resolvable:$true] %s14_s10 }
   0x3   :  { %s110_s12 = smov 16  }
   0x4   :  { %20 = dma.hbm_to_vmem [thread:$0]  %s13_s8, 512, %s15_s10, [#allocation3], %s109_s11, %s109_s11, %s110_s12  }
   0x5   :  { %104 = dma.done.wait [#allocation3], 512  }
   0x6   :  { %105 = vsyncadd [#allocation3], 4294966784  ;;  %s111_s13 = smov [#allocation5]   ;;  %s39_s17 = sshll.u32 %s129_s1, 4  ;;  %v25_v0 = vld [vmem:[#allocation2] sm:$0xff]  ;;  %v26_v1 = vld [vmem:[#allocation2 + $0x8] sm:$0xff]  ;;  %s40_s17 = int_to_ptr.hbm [resolvable:$true] %s39_s17 }
   0x7   :  { %s37_s14 = sshll.u32 %s111_s13, 4  ;;  %v27_v2 = vld [vmem:[#allocation2 + $0x10] sm:$0xff]  ;;  %29 = vst [vmem:[#allocation5] sm:$0xff] %v25_v0  ;;  %v28_v3 = vld [vmem:[#allocation2 + $0x18] sm:$0xff]  ;;  %s38_s14 = int_to_ptr.vmem [resolvable:$true] %s37_s14 }
   0x8   :  { %30 = vst [vmem:[#allocation5 + $0x8] sm:$0xff] %v26_v1 }
   0x9   :  { %31 = vst [vmem:[#allocation5 + $0x10] sm:$0xff] %v27_v2 }
   0xa   :  { %32 = vst [vmem:[#allocation5 + $0x18] sm:$0xff] %v28_v3 }
   0xb   :  { %45 = dma.vmem_to_hbm [thread:$0]  %s38_s14, 512, %s40_s17, [#allocation4], %s109_s11, %s109_s11, %s110_s12  }
   0xc   :  { %106 = dma.done.wait [#allocation4], 512  }
   0xd   :  { %107 = vsyncadd [#allocation4], 4294966784 }
   0xe   :  { %50 = vsyncpa [#allocation3], 1 }
   0xf   :  { %51 = vsyncpa [#allocation4], 1 }

</bundles_post_ra>
